<compile_context>
chip_gen: v5e
topology: v5e:2x2
jax: 0.10.0
libtpu: 0.0.40
codegen_flags: <defaults>
</compile_context>

<pallas_src>
import functools

import jax
import jax.numpy as jnp
from jax.experimental import pallas as pl
from jax.experimental.pallas import tpu as pltpu


def _round_up(n, m):
    return ((n + m - 1) // m) * m


def _classifier_kernel(x_ref, w1_ref, b1_ref, w2_ref, b2_ref, o_ref):
    # h = relu(x @ W1 + b1); bf16 x bf16 -> f32 accumulation on the MXU.
    h = jnp.dot(x_ref[...], w1_ref[...], preferred_element_type=jnp.float32)
    h = jnp.maximum(h + b1_ref[...], 0.0)
    # Dropout(p=0.3): identity at inference time (eval mode).
    # out = h @ W2 + b2 ; feed the second MXU pass in bf16, accumulate f32.
    out = jnp.dot(h.astype(w2_ref.dtype), w2_ref[...],
                  preferred_element_type=jnp.float32)
    o_ref[...] = (out + b2_ref[...]).astype(o_ref.dtype)


@functools.partial(jax.jit, static_argnames=("block_m",))
def genre_classifier_forward(x, w1, b1, w2, b2, *, block_m=512):
    """x: [B, 128] features from the base model; returns logits [B, num_classes]."""
    B, F = x.shape
    H = w1.shape[1]
    C = w2.shape[1]
    assert F == w1.shape[0] and H == w2.shape[0]

    LANES = 128
    # Lane-dense output: pad the class dim to a multiple of 128 with zeros so the
    # store path uses full unmasked vector stores. Padded columns are sliced off.
    c_pad = _round_up(C, LANES)
    w2_p = jnp.zeros((H, c_pad), w2.dtype).at[:, :C].set(w2)
    b2_p = jnp.zeros((1, c_pad), jnp.float32).at[:, :C].set(b2.astype(jnp.float32))

    # bf16 inputs/weights (memory-bound DMA), f32 biases + accumulation.
    x_bf = x.astype(jnp.bfloat16)
    w1_bf = w1.astype(jnp.bfloat16)
    w2_bf = w2_p.astype(jnp.bfloat16)
    b1_f = b1.astype(jnp.float32)

    # Batch tile: multiple of 8 sublanes, capped by block_m (block_m=512 keeps the
    # per-tile VMEM footprint ~1 MiB -> comfortably inside v7x's 64 MiB VMEM too).
    tm = min(block_m, _round_up(B, 8))
    b_pad = _round_up(B, tm)
    if b_pad != B:
        x_bf = jnp.zeros((b_pad, F), x_bf.dtype).at[:B, :].set(x_bf)

    grid = (b_pad // tm,)
    flops = 2 * b_pad * (F * H + H * c_pad)
    bytes_accessed = (x_bf.size * 2 + w1_bf.size * 2 + w2_bf.size * 2
                      + b1_f.size * 4 + b2_p.size * 4 + b_pad * c_pad * 4)

    out_pad = pl.pallas_call(
        _classifier_kernel,
        out_shape=jax.ShapeDtypeStruct((b_pad, c_pad), jnp.float32),
        grid=grid,
        in_specs=[
            pl.BlockSpec((tm, F), lambda i: (i, 0)),       # x tile (pipelined)
            pl.BlockSpec((F, H), lambda i: (0, 0)),        # W1 (VMEM-resident)
            pl.BlockSpec((1, H), lambda i: (0, 0)),        # b1
            pl.BlockSpec((H, c_pad), lambda i: (0, 0)),    # W2 (padded, resident)
            pl.BlockSpec((1, c_pad), lambda i: (0, 0)),    # b2 (padded)
        ],
        out_specs=pl.BlockSpec((tm, c_pad), lambda i: (i, 0)),
        compiler_params=pltpu.CompilerParams(
            # Batch tiles are independent -> shard across v7x's two TensorCores.
            dimension_semantics=("parallel",),
            vmem_limit_bytes=32 * 1024 * 1024,
        ),
        cost_estimate=pl.CostEstimate(
            flops=flops, transcendentals=0, bytes_accessed=bytes_accessed),
    )(x_bf, w1_bf, b1_f, w2_bf, b2_p)

    return out_pad[:B, :C]


def init_params(key, in_features=128, hidden=256, num_classes=10):
    # Deterministic synthetic init (PyTorch-style uniform bounds, not a checkpoint).
    k1, k2, k3, k4 = jax.random.split(key, 4)
    bound1 = 1.0 / jnp.sqrt(in_features)
    bound2 = 1.0 / jnp.sqrt(hidden)
    w1 = jax.random.uniform(k1, (in_features, hidden), jnp.float32, -bound1, bound1)
    b1 = jax.random.uniform(k2, (1, hidden), jnp.float32, -bound1, bound1)
    w2 = jax.random.uniform(k3, (hidden, num_classes), jnp.float32, -bound2, bound2)
    b2 = jax.random.uniform(k4, (1, num_classes), jnp.float32, -bound2, bound2)
    return w1, b1, w2, b2


if __name__ == "__main__":
    key = jax.random.PRNGKey(0)
    kx, kp = jax.random.split(key)

    batch, in_features, hidden, num_classes = 20, 128, 256, 10
    # x plays the role of base_model(x): [batch, 128] features.
    x = jax.random.normal(kx, (batch, in_features), jnp.float32)
    w1, b1, w2, b2 = init_params(kp, in_features, hidden, num_classes)

    # block_m=8 at this tiny batch exercises the batch-tiled grid (+ row padding).
    logits = genre_classifier_forward(x, w1, b1, w2, b2, block_m=8)
    logits = jax.block_until_ready(logits)

    # Reference in plain JAX replicating the same bf16-in / f32-accumulate math.
    x_bf = x.astype(jnp.bfloat16)
    h = jnp.dot(x_bf, w1.astype(jnp.bfloat16),
                preferred_element_type=jnp.float32) + b1
    h = jnp.maximum(h, 0.0)
    ref = jnp.dot(h.astype(jnp.bfloat16), w2.astype(jnp.bfloat16),
                  preferred_element_type=jnp.float32) + b2

    assert logits.shape == (batch, num_classes)
    assert jnp.allclose(logits, ref, atol=1e-2, rtol=1e-2)

    print("KERNEL_OK")
</pallas_src>

<mosaic_0001>
module attributes {stable_mosaic.version = 11 : i64} {
  func.func @_classifier_kernel(%arg0: i32, %arg1: memref<8x128xbf16, #tpu.memory_space<vmem>>, %arg2: memref<128x256xbf16, #tpu.memory_space<vmem>>, %arg3: memref<1x256xf32, #tpu.memory_space<vmem>>, %arg4: memref<256x128xbf16, #tpu.memory_space<vmem>>, %arg5: memref<1x128xf32, #tpu.memory_space<vmem>>, %arg6: memref<8x128xf32, #tpu.memory_space<vmem>>) attributes {dimension_semantics = [#tpu.dimension_semantics<parallel>], iteration_bounds = array<i64: 3>, scalar_prefetch = 0 : i64, scratch_operands = 0 : i64, tpu.core_type = #tpu.core_type<tc>, window_params = [{transform_indices = @transform_0, window_bounds = array<i64: 8, 128>}, {pipeline_mode = #tpu.pipeline_mode<synchronous>, transform_indices = @transform_1, window_bounds = array<i64: 128, 256>}, {pipeline_mode = #tpu.pipeline_mode<synchronous>, transform_indices = @transform_2, window_bounds = array<i64: 1, 256>}, {pipeline_mode = #tpu.pipeline_mode<synchronous>, transform_indices = @transform_3, window_bounds = array<i64: 256, 128>}, {pipeline_mode = #tpu.pipeline_mode<synchronous>, transform_indices = @transform_4, window_bounds = array<i64: 1, 128>}, {transform_indices = @transform_5, window_bounds = array<i64: 8, 128>}]} {
    %c0 = arith.constant 0 : index
    %c0_0 = arith.constant 0 : index
    %0 = vector.load %arg1[%c0, %c0_0] : memref<8x128xbf16, #tpu.memory_space<vmem>>, vector<8x128xbf16>
    %c0_1 = arith.constant 0 : index
    %c0_2 = arith.constant 0 : index
    %1 = vector.load %arg2[%c0_1, %c0_2] : memref<128x256xbf16, #tpu.memory_space<vmem>>, vector<128x256xbf16>
    %cst = arith.constant dense<0.000000e+00> : vector<8x256xf32>
    %2 = tpu.matmul %0, %1, %cst {dimension_numbers = #tpu.dot_dimension_numbers<[1], [0], [0], [1], [0, 0, 1, 1], [], []>} : vector<8x128xbf16>, vector<128x256xbf16>, vector<8x256xf32> -> vector<8x256xf32>
    %c0_3 = arith.constant 0 : index
    %c0_4 = arith.constant 0 : index
    %3 = vector.load %arg3[%c0_3, %c0_4] : memref<1x256xf32, #tpu.memory_space<vmem>>, vector<1x256xf32>
    %4 = vector.broadcast %3 : vector<1x256xf32> to vector<8x256xf32>
    %5 = arith.addf %2, %4 : vector<8x256xf32>
    %cst_5 = arith.constant 0.000000e+00 : f32
    %6 = vector.broadcast %cst_5 : f32 to vector<8x256xf32>
    %7 = arith.maximumf %5, %6 : vector<8x256xf32>
    %8 = arith.truncf %7 : vector<8x256xf32> to vector<8x256xbf16>
    %c0_6 = arith.constant 0 : index
    %c0_7 = arith.constant 0 : index
    %9 = vector.load %arg4[%c0_6, %c0_7] : memref<256x128xbf16, #tpu.memory_space<vmem>>, vector<256x128xbf16>
    %cst_8 = arith.constant dense<0.000000e+00> : vector<8x128xf32>
    %10 = tpu.matmul %8, %9, %cst_8 {dimension_numbers = #tpu.dot_dimension_numbers<[1], [0], [0], [1], [0, 0, 1, 1], [], []>} : vector<8x256xbf16>, vector<256x128xbf16>, vector<8x128xf32> -> vector<8x128xf32>
    %c0_9 = arith.constant 0 : index
    %c0_10 = arith.constant 0 : index
    %11 = vector.load %arg5[%c0_9, %c0_10] : memref<1x128xf32, #tpu.memory_space<vmem>>, vector<1x128xf32>
    %12 = vector.broadcast %11 : vector<1x128xf32> to vector<8x128xf32>
    %13 = arith.addf %10, %12 : vector<8x128xf32>
    %c0_11 = arith.constant 0 : index
    %c0_12 = arith.constant 0 : index
    %14 = vector.load %arg6[%c0_11, %c0_12] : memref<8x128xf32, #tpu.memory_space<vmem>>, vector<8x128xf32>
    tpu.vector_store %arg6[%c0_11, %c0_12], %13 {strides = array<i32>} : memref<8x128xf32, #tpu.memory_space<vmem>>, vector<8x128xf32>,
    return
  }
  func.func @transform_0(%arg0: i32) -> (i32, i32) {
    %c0_i32 = arith.constant 0 : i32
    %c0_i32_0 = arith.constant 0 : i32
    return %arg0, %c0_i32 : i32, i32
  }
  func.func @transform_1(%arg0: i32) -> (i32, i32) {
    %c0_i32 = arith.constant 0 : i32
    %c0_i32_0 = arith.constant 0 : i32
    %c0_i32_1 = arith.constant 0 : i32
    return %c0_i32, %c0_i32_0 : i32, i32
  }
  func.func @transform_2(%arg0: i32) -> (i32, i32) {
    %c0_i32 = arith.constant 0 : i32
    %c0_i32_0 = arith.constant 0 : i32
    %c0_i32_1 = arith.constant 0 : i32
    return %c0_i32, %c0_i32_0 : i32, i32
  }
  func.func @transform_3(%arg0: i32) -> (i32, i32) {
    %c0_i32 = arith.constant 0 : i32
    %c0_i32_0 = arith.constant 0 : i32
    %c0_i32_1 = arith.constant 0 : i32
    return %c0_i32, %c0_i32_0 : i32, i32
  }
  func.func @transform_4(%arg0: i32) -> (i32, i32) {
    %c0_i32 = arith.constant 0 : i32
    %c0_i32_0 = arith.constant 0 : i32
    %c0_i32_1 = arith.constant 0 : i32
    return %c0_i32, %c0_i32_0 : i32, i32
  }
  func.func @transform_5(%arg0: i32) -> (i32, i32) {
    %c0_i32 = arith.constant 0 : i32
    %c0_i32_0 = arith.constant 0 : i32
    return %arg0, %c0_i32 : i32, i32
  }
}

</mosaic_0001>

<bundles_post_ra>
// kernel: genre_classifier_forward.1
= control target key start
LH: loop header
LB: loop body
LE: loop exit
PB: predicated region body
PF: predicated region fallthrough
CT: control target
= control target key end

     0   :  { %s781_s18 = smov 0   ;;  %s956_s0 = inlined_call_operand.vmem [shape: bf16[24,128], index: 0, kind: input, shape index: {}]   ;;  %s957_s1 = inlined_call_operand.vmem [shape: bf16[128,256], index: 1, kind: input, shape index: {}]   ;;  %s958_s2 = inlined_call_operand.vmem [shape: f32[1,256], index: 2, kind: input, shape index: {}]   ;;  %s959_s3 = inlined_call_operand.vmem [shape: bf16[256,128], index: 3, kind: input, shape index: {}]   ;;  %s960_s4 = inlined_call_operand.vmem [shape: f32[1,128], index: 4, kind: input, shape index: {}]   ;;  %s961_s5 = inlined_call_operand.vmem [shape: f32[24,128], index: 5, kind: output, shape index: {}]  }
   0x1 LB: > { %s565_s19 = sadd.s32 4294967295, %s749_s18   ;;  %p569_p0 = scmp.ge.s32.totalorder %s749_s18, 1  ;;  %s749_s18 = sphi %s781_s18, %s15_s18  }
   0x2   : > { %p186_p1 = scmp.lt.s32.totalorder %s749_s18, 4 }
   0x4   : > { %p187_p2 = pnand %p569_p0, %p186_p1 }
   0x5   : > { %p212_p3 = scmp.lt.s32.totalorder (!%p187_p2), %s565_s19, 2 }
   0x6   : > { %190 = sbr.rel (%p187_p2) target bundleno = 318 (0x13e), region = 40 }
   0xb   : > { %v630_v0 = vld [vmem:[%s957_s1 + $0x70] sm:$0xf]  ;;  %v717_v1 = vld [vmem:[%s957_s1 + $0x74] sm:$0xf0]  ;;  %v716_v2 = vld [vmem:[%s957_s1 + $0x74] sm:$0xf] }
   0xc   : > { %v631_v3 = vor.u32 %v717_v1, %v630_v0  ;;  %v632_v4 = vld [vmem:[%s957_s1 + $0x78] sm:$0xf0]  ;;  %v622_v5 = vld [vmem:[%s957_s1 + $0x60] sm:$0xf]  ;;  %v715_v6 = vld [vmem:[%s957_s1 + $0x64] sm:$0xf0] }
   0xd   : > { %v635_v7 = vor.u32 %v716_v2, %v632_v4  ;;  %v714_v8 = vld [vmem:[%s957_s1 + $0x64] sm:$0xf]  ;;  %v624_v9 = vld [vmem:[%s957_s1 + $0x68] sm:$0xf0]  ;;  %v623_v10 = vor.u32 %v715_v6, %v622_v5  ;;  %v614_v12 = vld [vmem:[%s957_s1 + $0x50] sm:$0xf] }
   0xe   : > { %323 = vmatpush.bf16.msra.mxu0 %v631_v3  ;;  %v627_v11 = vor.u32 %v714_v8, %v624_v9  ;;  %v713_v13 = vld [vmem:[%s957_s1 + $0x54] sm:$0xf0]  ;;  %v712_v14 = vld [vmem:[%s957_s1 + $0x54] sm:$0xf]  ;;  %v616_v15 = vld [vmem:[%s957_s1 + $0x58] sm:$0xf0] }
   0xf   : > { %336 = vmatpush.bf16.msra.mxu1 %v635_v7  ;;  %v615_v16 = vor.u32 %v713_v13, %v614_v12  ;;  %v619_v17 = vor.u32 %v712_v14, %v616_v15  ;;  %v606_v18 = vld [vmem:[%s957_s1 + $0x40] sm:$0xf]  ;;  %v711_v19 = vld [vmem:[%s957_s1 + $0x44] sm:$0xf0]  ;;  %v710_v20 = vld [vmem:[%s957_s1 + $0x44] sm:$0xf] }
  0x10   : > { %v608_v21 = vld [vmem:[%s957_s1 + $0x48] sm:$0xf0]  ;;  %v725_v22 = vld [vmem:[%s959_s3 + $0x38] sm:$0xff]  ;;  %v607_v23 = vor.u32 %v711_v19, %v606_v18  ;;  %v598_v26 = vld [vmem:[%s957_s1 + $0x30] sm:$0xf]  ;;  %s963_s19 = smov (!%p212_p3, %s565_s19), 2 }
  0x11   : > { %v733_v24 = vld [vmem:[%s959_s3 + $0x78] sm:$0xff]  ;;  %v611_v25 = vor.u32 %v710_v20, %v608_v21  ;;  %485 = vmatpush.bf16.msra.mxu2 %v725_v22  ;;  %v724_v28 = vld [vmem:[%s959_s3 + $0x30] sm:$0xff]  ;;  %v590_v34 = vld [vmem:[%s957_s1 + $0x20] sm:$0xf]  ;;  %s570_s8 = sshll.u32 %s963_s19, 2  ;;  %s571_s7 = sshll.u32 %s963_s19, 3 }
  0x12   : > { %324 = vmatpush.bf16.msra.mxu0 %v623_v10  ;;  %v709_v27 = vld [vmem:[%s957_s1 + $0x34] sm:$0xf0]  ;;  %v708_v29 = vld [vmem:[%s957_s1 + $0x34] sm:$0xf]  ;;  %v600_v30 = vld [vmem:[%s957_s1 + $0x38] sm:$0xf0]  ;;  %498 = vmatpush.bf16.msra.mxu3 %v733_v24  ;;  %s215_s13 = scalar_lea.vmem %s956_s0, %s570_s8  ;;  %s219_s10 = scalar_lea.vmem %s961_s5, %s571_s7 }
  0x13   : > { %337 = vmatpush.bf16.msra.mxu1 %v627_v11  ;;  %v732_v31 = vld [vmem:[%s959_s3 + $0x70] sm:$0xff]  ;;  %v599_v32 = vor.u32 %v709_v27, %v598_v26  ;;  %v603_v33 = vor.u32 %v708_v29, %v600_v30  ;;  %v707_v35 = vld [vmem:[%s957_s1 + $0x24] sm:$0xf0]  ;;  %v706_v37 = vld [vmem:[%s957_s1 + $0x24] sm:$0xf] }
  0x14   : > { %v723_v36 = vld [vmem:[%s959_s3 + $0x28] sm:$0xff]  ;;  %v591_v40 = vor.u32 %v707_v35, %v590_v34  ;;  %v582_v42 = vld [vmem:[%s957_s1 + $0x10] sm:$0xf]  ;;  %v705_v43 = vld [vmem:[%s957_s1 + $0x14] sm:$0xf0] }
  0x15   : > { %486 = vmatpush.bf16.msra.mxu2 %v724_v28  ;;  %v592_v38 = vld [vmem:[%s957_s1 + $0x28] sm:$0xf0]  ;;  %v722_v44 = vld [vmem:[%s959_s3 + $0x20] sm:$0xff]  ;;  %v704_v45 = vld [vmem:[%s957_s1 + $0x14] sm:$0xf]  ;;  %v583_v48 = vor.u32 %v705_v43, %v582_v42 }
  0x16   : > { %325 = vmatpush.bf16.msra.mxu0 %v615_v16  ;;  %499 = vmatpush.bf16.msra.mxu3 %v732_v31  ;;  %v731_v39 = vld [vmem:[%s959_s3 + $0x68] sm:$0xff]  ;;  %v595_v41 = vor.u32 %v706_v37, %v592_v38  ;;  %v584_v46 = vld [vmem:[%s957_s1 + $0x18] sm:$0xf0]  ;;  %v730_v47 = vld [vmem:[%s959_s3 + $0x60] sm:$0xff] }
  0x17   : > { %338 = vmatpush.bf16.msra.mxu1 %v619_v17  ;;  %v587_v49 = vor.u32 %v704_v45, %v584_v46  ;;  %v574_v50 = vld [vmem:[%s957_s1] sm:$0xf]  ;;  %v703_v51 = vld [vmem:[%s957_s1 + $0x4] sm:$0xf0]  ;;  %v721_v52 = vld [vmem:[%s959_s3 + $0x18] sm:$0xff] }
  0x18   : > { %v702_v53 = vld [vmem:[%s957_s1 + $0x4] sm:$0xf]  ;;  %v576_v54 = vld [vmem:[%s957_s1 + $0x8] sm:$0xf0]  ;;  %v729_v55 = vld [vmem:[%s959_s3 + $0x58] sm:$0xff]  ;;  %v575_v56 = vor.u32 %v703_v51, %v574_v50 }
  0x19   : > { %487 = vmatpush.bf16.msra.mxu2 %v723_v36  ;;  %v579_v57 = vor.u32 %v702_v53, %v576_v54  ;;  %v720_v58 = vld [vmem:[%s959_s3 + $0x10] sm:$0xff]  ;;  %v220_v60 = vld [vmem:[%s215_s13] sm:$0xf]  ;;  %v719_v61 = vld [vmem:[%s959_s3 + $0x8] sm:$0xff] }
  0x1a   : > { %326 = vmatpush.bf16.msra.mxu0 %v607_v23  ;;  %500 = vmatpush.bf16.msra.mxu3 %v731_v39  ;;  %v728_v59 = vld [vmem:[%s959_s3 + $0x50] sm:$0xff]  ;;  %v727_v62 = vld [vmem:[%s959_s3 + $0x48] sm:$0xff]  ;;  %v718_v63 = vld [vmem:[%s959_s3] sm:$0xff] }
  0x1b   : > { %339 = vmatpush.bf16.msra.mxu1 %v611_v25  ;;  %v726_v0 = vld [vmem:[%s959_s3 + $0x40] sm:$0xff] }
  0x1c   : > { %v237_v1 = vld [vmem:[%s958_s2] sm:$0x3] }
  0x1d   : > { %488 = vmatpush.bf16.msra.mxu2 %v722_v44  ;;  %v239_v2 = vperm.slane %v237_v1, 0  ;;  %v240_v3 = vperm.slane %v237_v1, 1  ;;  %v742_v14 = vld [vmem:[%s960_s4] ss:$0 sm:$0xff] }
  0x1e   : > { %327 = vmatpush.bf16.msra.mxu0 %v599_v32  ;;  %501 = vmatpush.bf16.msra.mxu3 %v730_v47 }
  0x1f   : > { %340 = vmatpush.bf16.msra.mxu1 %v603_v33 }
  0x21   : > { %489 = vmatpush.bf16.msra.mxu2 %v721_v52 }
  0x22   : > { %328 = vmatpush.bf16.msra.mxu0 %v591_v40  ;;  %502 = vmatpush.bf16.msra.mxu3 %v729_v55 }
  0x23   : > { %341 = vmatpush.bf16.msra.mxu1 %v595_v41 }
  0x25   : > { %490 = vmatpush.bf16.msra.mxu2 %v720_v58 }
  0x26   : > { %329 = vmatpush.bf16.msra.mxu0 %v583_v48  ;;  %503 = vmatpush.bf16.msra.mxu3 %v728_v59 }
  0x27   : > { %342 = vmatpush.bf16.msra.mxu1 %v587_v49 }
  0x29   : > { %491 = vmatpush.bf16.msra.mxu2 %v719_v61 }
  0x2a   : > { %330 = vmatpush.bf16.msra.mxu0 %v575_v56  ;;  %504 = vmatpush.bf16.msra.mxu3 %v727_v62 }
  0x2b   : > { %343 = vmatpush.bf16.msra.mxu1 %v579_v57 }
  0x2d   : > { %331 = vmatmul.bf16.vlgmr.msra.gmra.mxu0 %v220_v60  ;;  %492 = vmatpush.bf16.msra.mxu2 %v718_v63 }
  0x2e   : > { %344 = vmatmul.bf16.vlgmr.msra.gmra.mxu1 %v220_v60  ;;  %505 = vmatpush.bf16.msra.mxu3 %v726_v0 }
  0xaa   : > { %v332_v4 = vpop.f32.mrf.mxu0 }
  0xab   : > { %v333_v5 = vadd.f32 %v332_v4, %v239_v2  ;;  %v345_v6 = vpop.f32.mrf.mxu1 }
  0xac   : > { %v346_v7 = vadd.f32 %v345_v6, %v240_v3 }
  0xad   : > { %v349_v8 = vmax.f32 %v333_v5, 0.0 }
  0xae   : > { %v350_v9 = vmax.f32 %v346_v7, 0.0 }
  0xaf   : > { %v351_v10 = vpack.c.bf16 %v349_v8, %v349_v8 }
  0xb0   : > { %v352_v11 = vpack.c.bf16 %v350_v9, %v350_v9 }
  0xb1   : > { %493 = vmatmul.bf16.vlgmr.msra.gmra.mxu2 %v351_v10 }
  0xb2   : > { %506 = vmatmul.bf16.vlgmr.msra.gmra.mxu3 %v352_v11  ;;  %v334_v12 = vpop.f32.mrf.mxu0 }
  0xb3   : > { %v347_v13 = vpop.f32.mrf.mxu1 }
 0x134   : > { %v494_v15 = vpop.f32.mrf.mxu2 }
 0x135   : > { %v495_v16 = vadd.f32 %v742_v14, %v494_v15  ;;  %v507_v17 = vpop.f32.mrf.mxu3 }
 0x137   : > { %v508_v18 = vadd.f32 %v507_v17, %v495_v16 }
 0x139   : > { %511 = vst [vmem:[%s219_s10] sm:$0xff] %v508_v18 }
 0x13c   : > { %v496_v19 = vpop.f32.mrf.mxu2 }
 0x13d   : > { %v509_v20 = vpop.f32.mrf.mxu3 }
 0x13e PF: > { %s15_s18 = sadd.s32 1, %s749_s18  }
 0x13f   : > { %p12_p4 = scmp.ge.s32.totalorder %s15_s18, 5  }
 0x141   :  { %14 = sbr.rel (!%p12_p4) target bundleno = 1 (0x1), region = 70 }

</bundles_post_ra>
